<compile_context>
chip_gen: v7x
topology: tpu7x:2x2x1
jax: 0.10.0
libtpu: 0.0.40
codegen_flags: <defaults>
</compile_context>

<pallas_src>
import functools

import numpy as np
import jax
import jax.numpy as jnp
from jax.experimental import pallas as pl
from jax.experimental.pallas import tpu as pltpu

GRID_SIZE = 20
N_POINTS = GRID_SIZE * GRID_SIZE            # 400 control points
WEIGHTS = (5000.0, 3000.0, 3000.0)
DEG2RAD = float(np.pi / 180.0)
_MAX_LANE_TILE = 2048                       # batch lanes per grid step (multiple of 128)


def _grid_moments():
    """Second moments of the fixed 20x20 control grid (float64 -> Python floats)."""
    ax = np.linspace(-1, 1, GRID_SIZE)
    X, Y = np.meshgrid(ax, ax)
    x = X.ravel().astype(np.float64)
    y = Y.ravel().astype(np.float64)
    s_r2 = float(np.sum(x * x + y * y))     # sum(x^2 + y^2)
    s_x = float(np.sum(x))                  # ~0, kept for exactness
    s_y = float(np.sum(y))                  # ~0
    return s_r2, s_x, s_y


_S_R2, _S_X, _S_Y = _grid_moments()


def _round_up(v, m):
    return (v + m - 1) // m * m


def _cdiv(a, b):
    return -(-a // b)


def _loss_kernel(theta_ref, theta_gt_ref, out_ref, *, c0, c12, cn, cx, cy):
    """One batch-lane tile: collapsed per-batch loss terms -> one partial sum.

    theta_ref / theta_gt_ref: (3, TB) with rows [angle_deg, scale, shift_y] and
    the batch on the lane axis.  out_ref: (1, 1, 128); partial sum -> lane 0.
    """
    th = theta_ref[...]
    tg = theta_gt_ref[...]

    # Lane-dense (1, TB) per-batch scalar algebra.
    ang = th[0:1, :] * DEG2RAD
    ang_g = tg[0:1, :] * DEG2RAD
    c, s = jnp.cos(ang), jnp.sin(ang)
    cg, sg = jnp.cos(ang_g), jnp.sin(ang_g)
    sc, scg = th[1:2, :], tg[1:2, :]
    dty = th[2:3, :] - tg[2:3, :]

    a1 = c - cg                       # stage-1 (rotation) difference coeffs
    b1 = s - sg
    a2 = sc * c - scg * cg            # stage-2 (rotation*scale) difference coeffs
    b2 = sc * s - scg * sg

    # Per-batch loss after collapsing the 400-point sums to grid moments:
    #   sum_n(dx1^2+dy1^2) = (a1^2+b1^2)*S
    #   sum_n(dx2^2+dy2^2) = (a2^2+b2^2)*S
    #   sum_n(dx2^2+dy3^2) = (a2^2+b2^2)*S + N*dty^2 + 2*dty*(b2*Sx + a2*Sy)
    # with weights / (B*N) folded into c0, c12, cn, cx, cy.  Zero-padded lanes
    # (theta = theta_GT = 0) give a1=b1=a2=b2=dty=0 and contribute exactly 0.
    term = (c0 * (a1 * a1 + b1 * b1)
            + c12 * (a2 * a2 + b2 * b2)
            + cn * (dty * dty)
            + dty * (cx * b2 + cy * a2))

    tile_sum = jnp.sum(term)          # (1, TB) -> scalar partial

    lane = jax.lax.broadcasted_iota(jnp.int32, out_ref.shape, out_ref.ndim - 1)
    out_ref[...] = jnp.where(lane == 0, tile_sum, 0.0)


@jax.jit
def sequential_grid_loss(theta, theta_gt):
    """theta, theta_GT: (B, 3) -> scalar float32 weighted sequential grid loss."""
    theta = theta.astype(jnp.float32)
    theta_gt = theta_gt.astype(jnp.float32)
    B = theta.shape[0]

    # Balanced lane tiling (avoids pathological padding for awkward B).
    n_target = _cdiv(B, _MAX_LANE_TILE)
    tb = _round_up(_cdiv(B, n_target), 128)
    num_tiles = _cdiv(B, tb)
    b_pad = num_tiles * tb

    # Batch on the lane axis; padded lanes are zeros (contribute 0 to the loss).
    theta_t = jnp.pad(theta.T, ((0, 0), (0, b_pad - B)))
    theta_gt_t = jnp.pad(theta_gt.T, ((0, 0), (0, b_pad - B)))

    inv = 1.0 / float(B * N_POINTS)                    # true (unpadded) mean denom
    w0, w1, w2 = (float(w) * inv for w in WEIGHTS)
    consts = dict(c0=w0 * _S_R2,
                  c12=(w1 + w2) * _S_R2,
                  cn=w2 * N_POINTS,
                  cx=2.0 * w2 * _S_X,
                  cy=2.0 * w2 * _S_Y)

    partial = pl.pallas_call(
        functools.partial(_loss_kernel, **consts),
        grid=(num_tiles,),
        in_specs=[
            pl.BlockSpec((3, tb), lambda i: (0, i)),
            pl.BlockSpec((3, tb), lambda i: (0, i)),
        ],
        out_specs=pl.BlockSpec((1, 1, 128), lambda i: (i, 0, 0)),
        out_shape=jax.ShapeDtypeStruct((num_tiles, 1, 128), jnp.float32),
        compiler_params=pltpu.CompilerParams(
            dimension_semantics=("parallel",)),
    )(theta_t, theta_gt_t)
    return jnp.sum(partial)


def _reference(theta, theta_gt):
    """Pure-JAX per-point replica of the PyTorch forward (correctness check)."""
    axis_coords = np.linspace(-1, 1, GRID_SIZE)
    X, Y = np.meshgrid(axis_coords, axis_coords)
    x = jnp.asarray(X.ravel(), dtype=jnp.float32)
    y = jnp.asarray(Y.ravel(), dtype=jnp.float32)

    def rot(t):
        a = t[:, 0:1] * DEG2RAD
        return (jnp.cos(a) * x - jnp.sin(a) * y,
                jnp.sin(a) * x + jnp.cos(a) * y)

    xr, yr = rot(theta)
    xr_g, yr_g = rot(theta_gt)
    l_rot = jnp.mean((xr - xr_g) ** 2 + (yr - yr_g) ** 2)

    xs, ys = theta[:, 1:2] * xr, theta[:, 1:2] * yr
    xs_g, ys_g = theta_gt[:, 1:2] * xr_g, theta_gt[:, 1:2] * yr_g
    l_sc = jnp.mean((xs - xs_g) ** 2 + (ys - ys_g) ** 2)

    xh, yh = xs, ys + theta[:, 2:3]
    xh_g, yh_g = xs_g, ys_g + theta_gt[:, 2:3]
    l_sh = jnp.mean((xh - xh_g) ** 2 + (yh - yh_g) ** 2)

    return WEIGHTS[0] * l_rot + WEIGHTS[1] * l_sc + WEIGHTS[2] * l_sh


if __name__ == "__main__":
    key = jax.random.PRNGKey(0)
    ka, kb, kc, kd, ke, kf = jax.random.split(key, 6)
    batch = 2
    # theta[:, 0]: rotation in degrees, theta[:, 1]: scale, theta[:, 2]: y-shift
    theta = jnp.stack([
        jax.random.uniform(ka, (batch,), minval=-30.0, maxval=30.0),
        jax.random.uniform(kb, (batch,), minval=0.8, maxval=1.2),
        jax.random.uniform(kc, (batch,), minval=-0.2, maxval=0.2),
    ], axis=1).astype(jnp.float32)
    theta_gt = jnp.stack([
        jax.random.uniform(kd, (batch,), minval=-30.0, maxval=30.0),
        jax.random.uniform(ke, (batch,), minval=0.8, maxval=1.2),
        jax.random.uniform(kf, (batch,), minval=-0.2, maxval=0.2),
    ], axis=1).astype(jnp.float32)

    loss = sequential_grid_loss(theta, theta_gt)
    jax.block_until_ready(loss)

    ref = _reference(theta, theta_gt)
    np.testing.assert_allclose(np.asarray(loss), np.asarray(ref),
                               rtol=1e-4, atol=1e-3)
    print("KERNEL_OK")
</pallas_src>

<mosaic_0001>
module attributes {stable_mosaic.version = 11 : i64} {
  func.func @_loss_kernel(%arg0: i32, %arg1: memref<3x128xf32, #tpu.memory_space<vmem>>, %arg2: memref<3x128xf32, #tpu.memory_space<vmem>>, %arg3: memref<1x1x128xf32, #tpu.memory_space<vmem>>) attributes {dimension_semantics = [#tpu.dimension_semantics<parallel>], iteration_bounds = array<i64: 1>, scalar_prefetch = 0 : i64, scratch_operands = 0 : i64, tpu.core_type = #tpu.core_type<tc>, window_params = [{transform_indices = @transform_0, window_bounds = array<i64: 3, 128>}, {transform_indices = @transform_1, window_bounds = array<i64: 3, 128>}, {transform_indices = @transform_2, window_bounds = array<i64: 1, 1, 128>}]} {
    %c0 = arith.constant 0 : index
    %c0_0 = arith.constant 0 : index
    %0 = vector.load %arg1[%c0, %c0_0] : memref<3x128xf32, #tpu.memory_space<vmem>>, vector<3x128xf32>
    %c0_1 = arith.constant 0 : index
    %c0_2 = arith.constant 0 : index
    %1 = vector.load %arg2[%c0_1, %c0_2] : memref<3x128xf32, #tpu.memory_space<vmem>>, vector<3x128xf32>
    %2 = vector.extract_strided_slice %0 {offsets = [0, 0], sizes = [1, 128], strides = [1, 1]} : vector<3x128xf32> to vector<1x128xf32>
    %cst = arith.constant 0.0174532924 : f32
    %3 = vector.broadcast %cst : f32 to vector<1x128xf32>
    %4 = arith.mulf %2, %3 : vector<1x128xf32>
    %5 = vector.extract_strided_slice %1 {offsets = [0, 0], sizes = [1, 128], strides = [1, 1]} : vector<3x128xf32> to vector<1x128xf32>
    %cst_3 = arith.constant 0.0174532924 : f32
    %6 = vector.broadcast %cst_3 : f32 to vector<1x128xf32>
    %7 = arith.mulf %5, %6 : vector<1x128xf32>
    %8 = math.cos %4 : vector<1x128xf32>
    %9 = math.sin %4 : vector<1x128xf32>
    %10 = math.cos %7 : vector<1x128xf32>
    %11 = math.sin %7 : vector<1x128xf32>
    %12 = vector.extract_strided_slice %0 {offsets = [1, 0], sizes = [1, 128], strides = [1, 1]} : vector<3x128xf32> to vector<1x128xf32>
    %13 = vector.extract_strided_slice %1 {offsets = [1, 0], sizes = [1, 128], strides = [1, 1]} : vector<3x128xf32> to vector<1x128xf32>
    %14 = vector.extract_strided_slice %0 {offsets = [2, 0], sizes = [1, 128], strides = [1, 1]} : vector<3x128xf32> to vector<1x128xf32>
    %15 = vector.extract_strided_slice %1 {offsets = [2, 0], sizes = [1, 128], strides = [1, 1]} : vector<3x128xf32> to vector<1x128xf32>
    %16 = arith.subf %14, %15 : vector<1x128xf32>
    %17 = arith.subf %8, %10 : vector<1x128xf32>
    %18 = arith.subf %9, %11 : vector<1x128xf32>
    %19 = arith.mulf %12, %8 : vector<1x128xf32>
    %20 = arith.mulf %13, %10 : vector<1x128xf32>
    %21 = arith.subf %19, %20 : vector<1x128xf32>
    %22 = arith.mulf %12, %9 : vector<1x128xf32>
    %23 = arith.mulf %13, %11 : vector<1x128xf32>
    %24 = arith.subf %22, %23 : vector<1x128xf32>
    %25 = arith.mulf %17, %17 : vector<1x128xf32>
    %26 = arith.mulf %18, %18 : vector<1x128xf32>
    %27 = arith.addf %25, %26 : vector<1x128xf32>
    %cst_4 = arith.constant 1842.10522 : f32
    %28 = vector.broadcast %cst_4 : f32 to vector<1x128xf32>
    %29 = arith.mulf %28, %27 : vector<1x128xf32>
    %30 = arith.mulf %21, %21 : vector<1x128xf32>
    %31 = arith.mulf %24, %24 : vector<1x128xf32>
    %32 = arith.addf %30, %31 : vector<1x128xf32>
    %cst_5 = arith.constant 2210.52637 : f32
    %33 = vector.broadcast %cst_5 : f32 to vector<1x128xf32>
    %34 = arith.mulf %33, %32 : vector<1x128xf32>
    %35 = arith.addf %29, %34 : vector<1x128xf32>
    %36 = arith.mulf %16, %16 : vector<1x128xf32>
    %cst_6 = arith.constant 1.500000e+03 : f32
    %37 = vector.broadcast %cst_6 : f32 to vector<1x128xf32>
    %38 = arith.mulf %37, %36 : vector<1x128xf32>
    %39 = arith.addf %35, %38 : vector<1x128xf32>
    %cst_7 = arith.constant -1.33226763E-13 : f32
    %40 = vector.broadcast %cst_7 : f32 to vector<1x128xf32>
    %41 = arith.mulf %40, %24 : vector<1x128xf32>
    %cst_8 = arith.constant -2.13162821E-13 : f32
    %42 = vector.broadcast %cst_8 : f32 to vector<1x128xf32>
    %43 = arith.mulf %42, %21 : vector<1x128xf32>
    %44 = arith.addf %41, %43 : vector<1x128xf32>
    %45 = arith.mulf %16, %44 : vector<1x128xf32>
    %46 = arith.addf %39, %45 : vector<1x128xf32>
    %47 = vector.shape_cast %46 : vector<1x128xf32> to vector<1x1x128xf32>
    %cst_9 = arith.constant dense<0.000000e+00> : vector<1xf32>
    %48 = vector.multi_reduction <add>, %47, %cst_9 [1, 2] : vector<1x1x128xf32> to vector<1xf32>
    %49 = vector.shape_cast %48 : vector<1xf32> to vector<1x1x1xf32>
    %50 = vector.extract %49[0, 0, 0] : f32 from vector<1x1x1xf32>
    %51 = tpu.iota {dimensions = array<i32: 2>} : vector<1x1x128xi32>
    %c0_i32 = arith.constant 0 : i32
    %52 = vector.broadcast %c0_i32 : i32 to vector<1x1x128xi32>
    %53 = arith.cmpi eq, %51, %52 : vector<1x1x128xi32>
    %cst_10 = arith.constant 0.000000e+00 : f32
    %54 = vector.broadcast %50 : f32 to vector<1x1x128xf32>
    %55 = vector.broadcast %cst_10 : f32 to vector<1x1x128xf32>
    %56 = arith.select %53, %54, %55 : vector<1x1x128xi1>, vector<1x1x128xf32>
    %c0_11 = arith.constant 0 : index
    %c0_12 = arith.constant 0 : index
    %c0_13 = arith.constant 0 : index
    %57 = vector.load %arg3[%c0_11, %c0_12, %c0_13] : memref<1x1x128xf32, #tpu.memory_space<vmem>>, vector<1x1x128xf32>
    tpu.vector_store %arg3[%c0_11, %c0_12, %c0_13], %56 {strides = array<i32>} : memref<1x1x128xf32, #tpu.memory_space<vmem>>, vector<1x1x128xf32>,
    return
  }
  func.func @transform_0(%arg0: i32) -> (i32, i32) {
    %c0_i32 = arith.constant 0 : i32
    %c0_i32_0 = arith.constant 0 : i32
    return %c0_i32, %arg0 : i32, i32
  }
  func.func @transform_1(%arg0: i32) -> (i32, i32) {
    %c0_i32 = arith.constant 0 : i32
    %c0_i32_0 = arith.constant 0 : i32
    return %c0_i32, %arg0 : i32, i32
  }
  func.func @transform_2(%arg0: i32) -> (i32, i32, i32) {
    %c0_i32 = arith.constant 0 : i32
    %c0_i32_0 = arith.constant 0 : i32
    %c0_i32_1 = arith.constant 0 : i32
    return %arg0, %c0_i32, %c0_i32_0 : i32, i32, i32
  }
}

</mosaic_0001>

<bundles_post_ra>
// kernel: sequential_grid_loss.1
= control target key start
LH: loop header
LB: loop body
LE: loop exit
PB: predicated region body
PF: predicated region fallthrough
CT: control target
= control target key end

     0   :  { %v540_v26 = vmov 683565275   ;;  %v541_v28 = vmov 2475754826   ;;  %v542_v30 = vmov 2131351028   ;;  %s652_s0 = inlined_call_operand.vmem [shape: f32[3,128], index: 0, kind: input, shape index: {}]   ;;  %s653_s1 = inlined_call_operand.vmem [shape: f32[3,128], index: 1, kind: input, shape index: {}]   ;;  %s654_s2 = inlined_call_operand.vmem [shape: f32[1,1,128], index: 2, kind: output, shape index: {}]  }
   0x1   :  { %v564_v0 = vld [vmem:[%s652_s0] sm:$0x7]  ;;  %v543_v32 = vmov 2102212464   ;;  %v544_v34 = vmov 920167782  }
   0x2   :  { %v569_v1 = vld [vmem:[%s653_s1] sm:$0x7]  ;;  %v572_v2 = vmul.f32 0.017453292, %v564_v0  ;;  %v545_v42 = vmov 1326507024  }
   0x3   :  { %v575_v3 = vmul.f32 0.017453292, %v569_v1 }
   0x4   :  { %v15_v4 = vand.u32 2147483647, %v572_v2  ;;  %v18_v5 = vand.u32 2139095040, %v572_v2  ;;  %vm17_vm14 = vcmp.lt.s32.totalorder %v572_v2, 0 }
   0x5   :  { %v222_v6 = vand.u32 2147483647, %v575_v3  ;;  %v225_v7 = vand.u32 2139095040, %v575_v3 }
   0x6   :  { %v19_v8 = vshrl.u32 %v18_v5, 23  ;;  %v22_v9 = vand.u32 8388607, %v15_v4  ;;  %vm16_vm15 = vcmp.le.f32.partialorder %v15_v4, 0.7853982 }
   0x7   :  { %v226_v10 = vshrl.u32 %v225_v7, 23  ;;  %v229_v11 = vand.u32 8388607, %v222_v6 }
   0x8   :  { %v500_v12 = vadd.s32 4294967169, %v19_v8  ;;  %v23_v15 = vor.u32 8388608, %v22_v9 }
   0x9   :  { %v508_v13 = vadd.s32 4294967169, %v226_v10  ;;  %v230_v16 = vor.u32 8388608, %v229_v11 }
   0xa   :  { %v25_v14 = vadd.s32 1, %v500_v12  ;;  %v585_v22 = vshll.u32 %v23_v15, 8 }
   0xb   :  { %v232_v17 = vadd.s32 1, %v508_v13  ;;  %v587_v24 = vshll.u32 %v230_v16, 8 }
   0xc   :  { %vm26_vm0 = vcmp.gt.s32.totalorder %v25_v14, 0 }
   0xd   :  { %v27_v18 = vsel %vm26_vm0, %v25_v14, 0  ;;  %vm233_vm1 = vcmp.gt.s32.totalorder %v232_v17, 0  ;;  %vm224_vm0 = vcmp.lt.s32.totalorder %v575_v3, 0 }
   0xe   :  { %v28_v19 = vshrl.u32 %v27_v18, 5  ;;  %v29_v20 = vand.u32 31, %v27_v18  ;;  %v234_v21 = vsel %vm233_vm1, %v232_v17, 0  ;;  %vm223_vm1 = vcmp.le.f32.partialorder %v222_v6, 0.7853982 }
   0xf   :  { %v236_v23 = vand.u32 31, %v234_v21  ;;  %v589_v36 = vshrl.u32 %v234_v21, 5 }
  0x10   :  { %v30_v25 = vsub.s32 32, %v29_v20  ;;  %v32_v27 = vshll.u32 %v540_v26, %v29_v20  ;;  %v35_v29 = vshll.u32 %v541_v28, %v29_v20  ;;  %v38_v31 = vshll.u32 %v542_v30, %v29_v20 }
  0x11   :  { %v41_v33 = vshll.u32 %v543_v32, %v29_v20  ;;  %v44_v35 = vshll.u32 %v544_v34, %v29_v20  ;;  %vm47_vm2 = vcmp.lt.s32.totalorder %v28_v19, 1  ;;  %vm48_vm3 = vcmp.lt.s32.totalorder %v28_v19, 2 }
  0x12   :  { %v31_v37 = vshrl.u32 %v540_v26, %v30_v25  ;;  %v33_v38 = vshrl.u32 %v541_v28, %v30_v25  ;;  %v36_v39 = vshrl.u32 %v542_v30, %v30_v25  ;;  %v39_v40 = vshrl.u32 %v543_v32, %v30_v25 }
  0x13   :  { %v42_v41 = vshrl.u32 %v544_v34, %v30_v25  ;;  %v45_v43 = vshrl.u32 %v545_v42, %v30_v25  ;;  %vm50_vm4 = vcmp.lt.s32.totalorder %v28_v19, 4  ;;  %v237_v47 = vsub.s32 32, %v236_v23 }
  0x14   :  { %v34_v44 = vor.u32 %v33_v38, %v32_v27  ;;  %v37_v45 = vor.u32 %v36_v39, %v35_v29  ;;  %v40_v46 = vor.u32 %v39_v40, %v38_v31  ;;  %vm49_vm5 = vcmp.lt.s32.totalorder %v28_v19, 3 }
  0x15   :  { %v43_v48 = vor.u32 %v42_v41, %v41_v33  ;;  %v46_v49 = vor.u32 %v45_v43, %v44_v35  ;;  %v239_v50 = vshll.u32 %v540_v26, %v236_v23  ;;  %v242_v58 = vshll.u32 %v541_v28, %v236_v23 }
  0x16   :  { %v51_v51 = vsel %vm47_vm2, %v31_v37, %v34_v44  ;;  %v52_v52 = vsel %vm50_vm4, %v40_v46, 2102212464  ;;  %v55_v53 = vsel %vm47_vm2, %v34_v44, %v37_v45  ;;  %v59_v54 = vsel %vm47_vm2, %v37_v45, %v40_v46 }
  0x17   :  { %v53_v55 = vsel %vm49_vm5, %v37_v45, %v52_v52  ;;  %v56_v56 = vsel %vm50_vm4, %v43_v48, 920167782  ;;  %v60_v57 = vsel %vm50_vm4, %v46_v49, 1326507024  ;;  %v238_v61 = vshrl.u32 %v540_v26, %v237_v47 }
  0x18   :  { %v57_v59 = vsel %vm49_vm5, %v40_v46, %v56_v56  ;;  %v61_v60 = vsel %vm49_vm5, %v43_v48, %v60_v57  ;;  %v240_v62 = vshrl.u32 %v541_v28, %v237_v47  ;;  %v54_v63 = vsel %vm48_vm3, %v51_v51, %v53_v55 }
  0x19   :  { %v58_v5 = vsel %vm48_vm3, %v55_v53, %v57_v59  ;;  %v62_v7 = vsel %vm48_vm3, %v59_v54, %v61_v60  ;;  %v243_v8 = vshrl.u32 %v542_v30, %v237_v47  ;;  %v245_v15 = vshll.u32 %v542_v30, %v236_v23 }
  0x1a   :  { %v598_v9 = vmul.u32.u64.low %v585_v22, %v62_v7  ;;  %v599_v10 = vmul.u32.u64.high %v585_v22, %v62_v7, %v598_v9  ;;  %v602_v11 = vmul.u32.u64.low %v585_v22, %v58_v5  ;;  %v603_v12 = vmul.u32.u64.high %v585_v22, %v58_v5, %v602_v11 }
  0x1b   :  { %v241_v13 = vor.u32 %v240_v62, %v239_v50  ;;  %v244_v14 = vor.u32 %v243_v8, %v242_v58  ;;  %v246_v16 = vshrl.u32 %v543_v32, %v237_v47  ;;  %v248_v17 = vshll.u32 %v543_v32, %v236_v23 }
  0x1c   :  { %v249_v18 = vshrl.u32 %v544_v34, %v237_v47  ;;  %v251_v20 = vshll.u32 %v544_v34, %v236_v23  ;;  %v252_v21 = vshrl.u32 %v545_v42, %v237_v47  ;;  %v70_v19 = vmul.u32 %v585_v22, %v54_v63 }
  0x1d   :  { %v247_v25 = vor.u32 %v246_v16, %v245_v15  ;;  %vm254_vm6 = vcmp.lt.s32.totalorder %v589_v36, 1  ;;  %vm255_vm7 = vcmp.lt.s32.totalorder %v589_v36, 2  ;;  %vm72_vm8 = vc.u32 %v599_v10, %v602_v11 }
  0x1e   :  { %v73_v26 = vadd.s32 1, %v603_v12  ;;  %v250_v27 = vor.u32 %v249_v18, %v248_v17  ;;  %vm256_vm9 = vcmp.lt.s32.totalorder %v589_v36, 3  ;;  %v253_v28 = vor.u32 %v252_v21, %v251_v20 }
  0x1f   :  { %vm257_vm10 = vcmp.lt.s32.totalorder %v589_v36, 4  ;;  %v258_v29 = vsel %vm254_vm6, %v238_v61, %v241_v13  ;;  %v262_v23 = vsel %vm254_vm6, %v241_v13, %v244_v14  ;;  %v266_v32 = vsel %vm254_vm6, %v244_v14, %v247_v25 }
  0x20   :  { %v74_v30 = vsel %vm72_vm8, %v73_v26, %v603_v12  ;;  %v259_v22 = vsel %vm257_vm10, %v247_v25, 2102212464  ;;  %v263_v31 = vsel %vm257_vm10, %v250_v27, 920167782  ;;  %v267_v37 = vsel %vm257_vm10, %v253_v28, 1326507024 }
  0x21   :  { %v75_v33 = vadd.s32 %v74_v30, %v70_v19  ;;  %v260_v34 = vsel %vm256_vm9, %v244_v14, %v259_v22  ;;  %v264_v35 = vsel %vm256_vm9, %v247_v25, %v263_v31  ;;  %v268_v40 = vsel %vm256_vm9, %v250_v27, %v267_v37 }
  0x22   :  { %v261_v38 = vsel %vm255_vm7, %v258_v29, %v260_v34  ;;  %v265_v39 = vsel %vm255_vm7, %v262_v23, %v264_v35  ;;  %v269_v42 = vsel %vm255_vm7, %v266_v32, %v268_v40  ;;  %v71_v61 = vadd.s32 %v602_v11, %v599_v10 }
  0x23   :  { %v76_v41 = vadd.s32 536870912, %v75_v33  ;;  %v620_v43 = vmul.u32.u64.low %v587_v24, %v265_v39  ;;  %v621_v44 = vmul.u32.u64.high %v587_v24, %v265_v39, %v620_v43  ;;  %v277_v48 = vmul.u32 %v587_v24, %v261_v38 }
  0x24   :  { %v624_v45 = vmul.u32.u64.low %v587_v24, %v269_v42  ;;  %v625_v46 = vmul.u32.u64.high %v587_v24, %v269_v42, %v624_v45  ;;  %vm107_vm8 = vweird.f32 %v572_v2 }
  0x25   :  { %v77_v47 = vshrl.u32 %v76_v41, 30  ;;  %v280_v50 = vadd.s32 1, %v621_v44 }
  0x26   :  { %vm279_vm11 = vc.u32 %v625_v46, %v620_v43  ;;  %v278_v20 = vadd.s32 %v620_v43, %v625_v46 }
  0x27   :  { %v78_v49 = vshll.u32 %v77_v47, 30  ;;  %v281_v36 = vsel %vm279_vm11, %v280_v50, %v621_v44  ;;  %v101_v10 = vsub.s32 4, %v77_v47 }
  0x28   :  { %v282_v52 = vadd.s32 %v281_v36, %v277_v48 }
  0x29   :  { %v79_v51 = vsub.s32 %v75_v33, %v78_v49  ;;  %v102_v30 = vsel %vm17_vm14, %v101_v10, %v77_v47 }
  0x2a   :  { %v283_v54 = vadd.s32 536870912, %v282_v52  ;;  %v104_v34 = vsel %vm16_vm15, 0, %v102_v30 }
  0x2b   :  { %v81_v53 = vsub.s32 0, %v79_v51  ;;  %v211_v40 = vadd.s32 3, %v104_v34  ;;  %v108_v43 = vand.u32 3, %v104_v34 }
  0x2c   :  { %v284_v56 = vshrl.u32 %v283_v54, 30 }
  0x2d   :  { %v501_v55 = vmin.u32 %v81_v53, %v79_v51  ;;  %v212_v44 = vand.u32 3, %v211_v40  ;;  %vm113_vm2 = vcmp.eq.s32.totalorder %v108_v43, 2  ;;  %vm110_vm4 = vcmp.eq.s32.totalorder %v108_v43, 0 }
  0x2e   :  { %v285_v58 = vshll.u32 %v284_v56, 30  ;;  %v308_v39 = vsub.s32 4, %v284_v56  ;;  %vm109_vm6 = vcmp.lt.s32.totalorder %v108_v43, 2 }
  0x2f   :  { %v83_v57 = vclz %v501_v55  ;;  %vm217_vm3 = vcmp.eq.s32.totalorder %v212_v44, 2  ;;  %vm214_vm5 = vcmp.eq.s32.totalorder %v212_v44, 0  ;;  %vm213_vm7 = vcmp.lt.s32.totalorder %v212_v44, 2 }
  0x30   :  { %v286_v60 = vsub.s32 %v282_v52, %v285_v58  ;;  %v309_v42 = vsel %vm224_vm0, %v308_v39, %v284_v56 }
  0x31   :  { %v502_v59 = vadd.s32 4294967294, %v83_v57  ;;  %v311_v47 = vsel %vm223_vm1, 0, %v309_v42 }
  0x32   :  { %v288_v62 = vsub.s32 0, %v286_v60  ;;  %v315_v57 = vand.u32 3, %v311_v47 }
  0x33   :  { %vm503_vm12 = vcmp.lt.s32.totalorder %v502_v59, 0 }
  0x34   :  { %v86_v24 = vsel %vm503_vm12, 0, %v502_v59  ;;  %v509_v8 = vmin.u32 %v288_v62, %v286_v60  ;;  %vm320_vm9 = vcmp.eq.s32.totalorder %v315_v57, 2  ;;  %vm316_vm11 = vcmp.lt.s32.totalorder %v315_v57, 2 }
  0x35   :  { %v87_v63 = vsub.s32 32, %v86_v24  ;;  %v88_v5 = vshll.u32 %v79_v51, %v86_v24  ;;  %v91_v7 = vsub.s32 4294967266, %v86_v24  ;;  %v418_v51 = vadd.s32 3, %v311_v47 }
  0x36   :  { %v290_v13 = vclz %v509_v8  ;;  %vm317_vm12 = vcmp.eq.s32.totalorder %v315_v57, 0 }
  0x37   :  { %v89_v9 = vshrl.u32 %v71_v61, %v87_v63  ;;  %v92_v12 = vadd.s32 127, %v91_v7  ;;  %v419_v58 = vand.u32 3, %v418_v51 }
  0x38   :  { %v510_v16 = vadd.s32 4294967294, %v290_v13 }
  0x39   :  { %v90_v14 = vor.u32 %v89_v9, %v88_v5  ;;  %v93_v15 = vshll.u32 %v92_v12, 23  ;;  %vm424_vm10 = vcmp.eq.s32.totalorder %v419_v58, 2 }
  0x3a   :  { %vm511_vm13 = vcmp.lt.s32.totalorder %v510_v16, 0 }
  0x3b   :  { %v94_v17 = vor.u32 4788187, %v93_v15  ;;  %v97_v18 = vcvt.s32.f32 %v90_v14  ;;  %v293_v11 = vsel %vm511_vm13, 0, %v510_v16  ;;  %vm421_vm13 = vcmp.eq.s32.totalorder %v419_v58, 0 }
  0x3c   :  { %v294_v19 = vsub.s32 32, %v293_v11  ;;  %v295_v25 = vshll.u32 %v286_v60, %v293_v11  ;;  %v298_v26 = vsub.s32 4294967266, %v293_v11  ;;  %v429_v15 = vsub.f32 %v564_v0, %v569_v1 }
  0x3d   :  { %v95_v21 = vand.u32 2147483647, %v94_v17 }
  0x3e   :  { %v296_v28 = vshrl.u32 %v278_v20, %v294_v19  ;;  %v299_v29 = vadd.s32 127, %v298_v26 }
  0x3f   :  { %v98_v27 = vmul.f32 %v97_v18, %v95_v21 }
  0x40   :  { %v297_v22 = vor.u32 %v296_v28, %v295_v25  ;;  %v300_v31 = vshll.u32 %v299_v29, 23 }
  0x41   :  { %v99_v23 = vxor.u32 2147483648, %v98_v27 }
  0x42   :  { %v301_v35 = vor.u32 4788187, %v300_v31  ;;  %v304_v37 = vcvt.s32.f32 %v297_v22 }
  0x43   :  { %v100_v32 = vsel %vm17_vm14, %v99_v23, %v98_v27  ;;  %vm420_vm14 = vcmp.lt.s32.totalorder %v419_v58, 2  ;;  %v462_v23 = vmul.f32 %v429_v15, %v429_v15 }
  0x44   :  { %v103_v33 = vsel %vm16_vm15, %v572_v2, %v100_v32  ;;  %v302_v38 = vand.u32 2147483647, %v301_v35  ;;  %vm314_vm15 = vweird.f32 %v575_v3 }
  0x45   :  { %532 = vcosq.f32 %v103_v33 }
  0x46   :  { %534 = vsinq.f32 %v103_v33  ;;  %v305_v41 = vmul.f32 %v304_v37, %v302_v38 }
  0x48   :  { %v306_v4 = vxor.u32 2147483648, %v305_v41 }
  0x4a   :  { %v307_v45 = vsel %vm224_vm0, %v306_v4, %v305_v41  ;;  %vm479_vm0 = vcmask 1040384  }
  0x4b   :  { %v310_v46 = vsel %vm223_vm1, %v575_v3, %v307_v45 }
  0x4c   :  { %536 = vcosq.f32 %v310_v46 }
  0x4d   :  { %538 = vsinq.f32 %v310_v46 }
  0x4f   :  { %v533_v48 = vpop.eup %532 }
  0x50   :  { %v535_v49 = vpop.eup %534  ;;  %v114_v50 = vxor.u32 2147483648, %v533_v48 }
  0x51   :  { %v111_v6 = vxor.u32 2147483648, %v535_v49 }
  0x52   :  { %v115_v36 = vsel %vm113_vm2, %v114_v50, %v535_v49  ;;  %v219_v52 = vsel %vm217_vm3, %v114_v50, %v535_v49 }
  0x53   :  { %v112_v53 = vsel %vm110_vm4, %v533_v48, %v111_v6  ;;  %v216_v54 = vsel %vm214_vm5, %v533_v48, %v111_v6 }
  0x54   :  { %v116_v55 = vsel %vm109_vm6, %v112_v53, %v115_v36  ;;  %v220_v56 = vsel %vm213_vm7, %v216_v54, %v219_v52  ;;  %v490_v36 = vlaneseq }
  0x55   :  { %v117_v59 = vsel %vm107_vm8, nan, %v116_v55  ;;  %v221_v60 = vsel %vm107_vm8, nan, %v220_v56 }
  0x56   :  { %v537_v61 = vpop.eup %536  ;;  %v433_v5 = vrot.slane %v117_v59, 7  ;;  %v442_v2 = vrot.slane %v221_v60, 7  ;;  %v491_v52 = vand.u32 127, %v490_v36 }
  0x57   :  { %v539_v24 = vpop.eup %538  ;;  %v321_v62 = vxor.u32 2147483648, %v537_v61 }
  0x58   :  { %v318_v63 = vxor.u32 2147483648, %v539_v24  ;;  %v435_v18 = vmul.f32 %v433_v5, %v564_v0  ;;  %v444_v20 = vmul.f32 %v442_v2, %v564_v0  ;;  %v463_v0 = vmul.f32 1500.0, %v462_v23 }
  0x59   :  { %v322_v7 = vsel %vm320_vm9, %v321_v62, %v539_v24  ;;  %v426_v8 = vsel %vm424_vm10, %v321_v62, %v539_v24  ;;  %vm492_vm1 = vcmp.eq.s32.totalorder %v491_v52, 0 }
  0x5a   :  { %v319_v9 = vsel %vm317_vm12, %v537_v61, %v318_v63  ;;  %v423_v12 = vsel %vm421_vm13, %v537_v61, %v318_v63  ;;  %v465_v41 = vrot.slane %v463_v0, 2 }
  0x5b   :  { %v323_v13 = vsel %vm316_vm11, %v319_v9, %v322_v7  ;;  %v427_v14 = vsel %vm420_vm14, %v423_v12, %v426_v8 }
  0x5c   :  { %v324_v16 = vsel %vm314_vm15, nan, %v323_v13  ;;  %v428_v17 = vsel %vm314_vm15, nan, %v427_v14 }
  0x5d   :  { %v430_v21 = vsub.f32 %v117_v59, %v324_v16  ;;  %v431_v10 = vsub.f32 %v221_v60, %v428_v17  ;;  %v437_v11 = vrot.slane %v324_v16, 7  ;;  %v446_v19 = vrot.slane %v428_v17, 7 }
  0x5f   :  { %v439_v3 = vmul.f32 %v437_v11, %v569_v1  ;;  %v448_v25 = vmul.f32 %v446_v19, %v569_v1  ;;  %v450_v26 = vmul.f32 %v430_v21, %v430_v21  ;;  %v451_v27 = vmul.f32 %v431_v10, %v431_v10 }
  0x61   :  { %v440_v28 = vsub.f32 %v435_v18, %v439_v3  ;;  %v449_v29 = vsub.f32 %v444_v20, %v448_v25  ;;  %v452_v30 = vadd.f32 %v451_v27, %v450_v26 }
  0x63   :  { %v454_v22 = vmul.f32 %v440_v28, %v440_v28  ;;  %v455_v31 = vmul.f32 %v449_v29, %v449_v29  ;;  %v468_v32 = vmul.f32 -1.3322676e-13, %v449_v29  ;;  %v469_v33 = vmul.f32 -2.1316282e-13, %v440_v28 }
  0x64   :  { %v453_v37 = vmul.f32 1842.1052, %v452_v30 }
  0x65   :  { %v456_v34 = vadd.f32 %v455_v31, %v454_v22  ;;  %v470_v35 = vadd.f32 %v469_v33, %v468_v32 }
  0x67   :  { %v457_v38 = vmul.f32 2210.5264, %v456_v34  ;;  %v472_v39 = vrot.slane %v470_v35, 7 }
  0x69   :  { %v459_v40 = vrot.slane %v457_v38, 1  ;;  %v474_v4 = vmul.f32 %v472_v39, %v429_v15 }
  0x6b   :  { %v461_v1 = vadd.f32 %v459_v40, %v453_v37  ;;  %v476_v42 = vrot.slane %v474_v4, 2 }
  0x6d   :  { %v467_v43 = vadd.f32 %v465_v41, %v461_v1 }
  0x6f   :  { %v478_v44 = vadd.f32 %v476_v42, %v467_v43 }
  0x71   :  { %v480_v45 = vsel %vm479_vm0, %v478_v44, 0.0 }
  0x72   :  { %481 = vadd.xlane.f32.xlu0 %v480_v45 }
  0xff   :  { %v482_v46 = vpop.xlane.xlu0 %481 }
 0x100   :  { %v483_v47 = vrot.slane %v482_v46, 4 }
 0x102   :  { %v484_v48 = vadd.f32 %v483_v47, %v482_v46 }
 0x104   :  { %v485_v49 = vrot.slane %v484_v48, 2 }
 0x106   :  { %v486_v50 = vadd.f32 %v485_v49, %v484_v48 }
 0x108   :  { %v487_v51 = vrot.slane %v486_v50, 1 }
 0x10a   :  { %v488_v6 = vadd.f32 %v487_v51, %v486_v50 }
 0x10c   :  { %524 = vpush %v488_v6 }
 0x13d   :  { %s525_s0 = spop %524 }
 0x13e   :  { %v493_v53 = vstv %s525_s0 }
 0x13f   :  { %v494_v54 = vsel %vm492_vm1, %v493_v53, 0.0 }
 0x140   :  { %495 = vst [vmem:[%s654_s2] sm:$0x1] %v494_v54 }

</bundles_post_ra>
